<compile_context>
chip_gen: v6e
topology: v6e:2x2x1
jax: 0.10.0
libtpu: 0.0.40
codegen_flags: <defaults>
</compile_context>

<pallas_src>
import functools

import jax
import jax.numpy as jnp
from jax.experimental import pallas as pl
from jax.experimental.pallas import tpu as pltpu

_VMEM_LIMIT = 32 * 1024 * 1024
_NEG_MASK = -9e15


def _elu(x):
    return jnp.where(x > 0, x, jnp.exp(x) - 1.0)


def _pick_tile(n, candidates=(512, 256, 128)):
    """Largest candidate tile that divides n, else the full extent."""
    for c in candidates:
        if n % c == 0:
            return c
    return n


def proj_kernel(x_ref, wf_ref, wh_ref, fsrc_ref, fdst_t_ref, *, nheads, nhid):
    """z = x @ [W_all | W a_src^T | W a_dst^T]  ->  (Wh_all, f_src, f_dst^T)."""
    H = nheads * nhid
    z = jnp.dot(x_ref[...], wf_ref[...], preferred_element_type=jnp.float32)
    wh_ref[...] = z[:, :H]                                   # (tq, nheads*nhid)
    fsrc_ref[...] = z[:, H:H + nheads]                       # (tq, nheads)
    fdst_t_ref[...] = z[:, H + nheads:H + 2 * nheads].T      # (nheads, tq)


def attn_kernel(fsrc_ref, fdst_t_ref, wh_ref, adj_ref, out_ref,
                m_sc, l_sc, acc_sc, *,
                nheads, nhid, alpha, concat_elu, log_softmax_out):
    """One (row-tile, col-tile) step of online-softmax graph attention."""
    ki = pl.program_id(1)

    @pl.when(ki == 0)
    def _():
        m_sc[...] = jnp.full_like(m_sc, -jnp.inf)
        l_sc[...] = jnp.zeros_like(l_sc)
        acc_sc[...] = jnp.zeros_like(acc_sc)

    adj_pos = adj_ref[...] > 0                               # (tq, tk) edge mask
    fsrc = fsrc_ref[...]                                     # (tq, nheads)
    fdst_t = fdst_t_ref[...]                                 # (nheads, tk)
    wh_k = wh_ref[...]                                       # (tk, nheads*nhid)

    for h in range(nheads):                                  # static unroll
        e = fsrc[:, h:h + 1] + fdst_t[h:h + 1, :]            # (tq, tk)
        e = jnp.where(e > 0, e, alpha * e)                   # LeakyReLU(alpha)
        e = jnp.where(adj_pos, e, jnp.float32(_NEG_MASK))    # mask non-edges
        m_prev = m_sc[h]                                     # (tq, 1)
        m_new = jnp.maximum(m_prev, jnp.max(e, axis=1, keepdims=True))
        corr = jnp.exp(m_prev - m_new)
        p = jnp.exp(e - m_new)
        l_sc[h] = corr * l_sc[h] + jnp.sum(p, axis=1, keepdims=True)
        acc_sc[h] = corr * acc_sc[h] + jnp.dot(
            p, wh_k[:, h * nhid:(h + 1) * nhid],
            preferred_element_type=jnp.float32)
        m_sc[h] = m_new

    @pl.when(ki == pl.num_programs(1) - 1)
    def _():
        # Note: a row with no edges (and no self-loop) degenerates to a uniform
        # softmax over all nodes — identical to the torch reference behaviour.
        outs = [acc_sc[h] * pl.reciprocal(l_sc[h], approx=True)
                for h in range(nheads)]
        res = outs[0] if nheads == 1 else jnp.concatenate(outs, axis=-1)
        if log_softmax_out:
            res = _elu(res)
            res = res - jnp.max(res, axis=1, keepdims=True)
            res = res - jnp.log(jnp.sum(jnp.exp(res), axis=1, keepdims=True))
        elif concat_elu:
            res = _elu(res)
        out_ref[...] = res


def _gat_attention_layer(x, adj_mask, w_fused, nheads, nhid, alpha, *,
                         concat_elu, log_softmax_out):
    """One GAT attention layer (all heads at once)."""
    N, nfeat = x.shape
    H = nheads * nhid
    df = w_fused.shape[1]
    tq = _pick_tile(N)
    tk = _pick_tile(N)

    # Projection: one wide matmul for all heads; src/dst logits folded in.
    wh, fsrc, fdst_t = pl.pallas_call(
        functools.partial(proj_kernel, nheads=nheads, nhid=nhid),
        out_shape=(jax.ShapeDtypeStruct((N, H), jnp.float32),
                   jax.ShapeDtypeStruct((N, nheads), jnp.float32),
                   jax.ShapeDtypeStruct((nheads, N), jnp.float32)),
        grid=(N // tq,),
        in_specs=[pl.BlockSpec((tq, nfeat), lambda i: (i, 0)),
                  pl.BlockSpec((nfeat, df), lambda i: (0, 0))],
        out_specs=(pl.BlockSpec((tq, H), lambda i: (i, 0)),
                   pl.BlockSpec((tq, nheads), lambda i: (i, 0)),
                   pl.BlockSpec((nheads, tq), lambda i: (0, i))),
        compiler_params=pltpu.CompilerParams(
            dimension_semantics=("parallel",),
            vmem_limit_bytes=_VMEM_LIMIT),
    )(x, w_fused)

    # Flash-style attention: rows parallel, column/reduction axis last.
    out = pl.pallas_call(
        functools.partial(attn_kernel, nheads=nheads, nhid=nhid, alpha=alpha,
                          concat_elu=concat_elu,
                          log_softmax_out=log_softmax_out),
        out_shape=jax.ShapeDtypeStruct((N, H), jnp.float32),
        grid=(N // tq, N // tk),
        in_specs=[pl.BlockSpec((tq, nheads), lambda qi, ki: (qi, 0)),
                  pl.BlockSpec((nheads, tk), lambda qi, ki: (0, ki)),
                  pl.BlockSpec((tk, H), lambda qi, ki: (ki, 0)),
                  pl.BlockSpec((tq, tk), lambda qi, ki: (qi, ki))],
        out_specs=pl.BlockSpec((tq, H), lambda qi, ki: (qi, 0)),
        scratch_shapes=[pltpu.VMEM((nheads, tq, 1), jnp.float32),
                        pltpu.VMEM((nheads, tq, 1), jnp.float32),
                        pltpu.VMEM((nheads, tq, nhid), jnp.float32)],
        compiler_params=pltpu.CompilerParams(
            dimension_semantics=("parallel", "arbitrary"),
            vmem_limit_bytes=_VMEM_LIMIT),
    )(fsrc, fdst_t, wh, adj_mask)
    return out


def gat_forward(x, adj, params, alpha):
    """Full GAT forward.  x: (N, nfeat), adj: (N, N)."""
    W_h, a_src_h, a_dst_h, W_o, a_src_o, a_dst_o = params
    nheads, nfeat, nhid = W_h.shape
    nclass = W_o.shape[1]

    # 0/1 edge mask streamed as bf16 (exact for a {0,1} adjacency, 2x less HBM).
    adj_mask = (adj > 0).astype(jnp.bfloat16)

    # Layer 1 fused weight: [W_all | W_h @ a_src^T | W_h @ a_dst^T]
    # W_all column block h equals W_h[h]  ->  lane-dense head-concat projection.
    W_all = jnp.transpose(W_h, (1, 0, 2)).reshape(nfeat, nheads * nhid)
    Wa_src = jnp.einsum('hfo,ho->fh', W_h, a_src_h[:, 0, :])
    Wa_dst = jnp.einsum('hfo,ho->fh', W_h, a_dst_h[:, 0, :])
    W_fused1 = jnp.concatenate([W_all, Wa_src, Wa_dst], axis=1)

    # Multi-head layer: ELU per head, output written directly in concat layout.
    h_cat = _gat_attention_layer(x, adj_mask, W_fused1, nheads, nhid, alpha,
                                 concat_elu=True, log_softmax_out=False)

    # Output layer (single head, concat=False) + ELU + log_softmax, in-kernel.
    W_fused2 = jnp.concatenate([W_o, W_o @ a_src_o.T, W_o @ a_dst_o.T], axis=1)
    out = _gat_attention_layer(h_cat, adj_mask, W_fused2, 1, nclass, alpha,
                               concat_elu=False, log_softmax_out=True)
    return out


def xavier_uniform(key, shape, gain=1.414):
    fan_in, fan_out = shape[-2], shape[-1]
    bound = gain * (6.0 / (fan_in + fan_out)) ** 0.5
    return jax.random.uniform(key, shape, jnp.float32, -bound, bound)


if __name__ == "__main__":
    # Small, module-consistent shapes.
    N, nfeat, nhid, nclass, nheads = 8, 16, 8, 4, 4
    alpha = 0.2
    dropout = 0.6  # eval mode -> identity (not applied)

    key = jax.random.PRNGKey(0)
    keys = jax.random.split(key, 6)

    x = jax.random.normal(keys[0], (N, nfeat), jnp.float32)
    adj_rand = jax.random.uniform(keys[1], (N, N)) > 0.5
    adj = (adj_rand | adj_rand.T | jnp.eye(N, dtype=bool)).astype(jnp.float32)

    # Per-head parameters: W (nfeat, nhid), a (2*nhid, 1) split into src/dst halves.
    W_h = xavier_uniform(keys[2], (nheads, nfeat, nhid))
    a_h = xavier_uniform(keys[3], (nheads, 2 * nhid, 1))
    a_src_h = jnp.transpose(a_h[:, :nhid, :], (0, 2, 1))   # (nheads, 1, nhid)
    a_dst_h = jnp.transpose(a_h[:, nhid:, :], (0, 2, 1))   # (nheads, 1, nhid)

    # Output layer parameters: W (nhid*nheads, nclass), a (2*nclass, 1).
    W_o = xavier_uniform(keys[4], (nhid * nheads, nclass))
    a_o = xavier_uniform(keys[5], (2 * nclass, 1))
    a_src_o = a_o[:nclass, :].T                             # (1, nclass)
    a_dst_o = a_o[nclass:, :].T                             # (1, nclass)

    params = (W_h, a_src_h, a_dst_h, W_o, a_src_o, a_dst_o)
    out = gat_forward(x, adj, params, alpha)
    jax.block_until_ready(out)
    assert out.shape == (N, nclass) and out.dtype == jnp.float32
    print("KERNEL_OK")
</pallas_src>

<mosaic_0001>
module attributes {stable_mosaic.version = 11 : i64} {
  func.func @proj_kernel(%arg0: i32, %arg1: memref<8x16xf32, #tpu.memory_space<vmem>>, %arg2: memref<16x40xf32, #tpu.memory_space<vmem>>, %arg3: memref<8x32xf32, #tpu.memory_space<vmem>>, %arg4: memref<8x4xf32, #tpu.memory_space<vmem>>, %arg5: memref<4x8xf32, #tpu.memory_space<vmem>>) attributes {dimension_semantics = [#tpu.dimension_semantics<parallel>], iteration_bounds = array<i64: 1>, scalar_prefetch = 0 : i64, scratch_operands = 0 : i64, tpu.core_type = #tpu.core_type<tc>, window_params = [{transform_indices = @transform_0, window_bounds = array<i64: 8, 16>}, {pipeline_mode = #tpu.pipeline_mode<synchronous>, transform_indices = @transform_1, window_bounds = array<i64: 16, 40>}, {transform_indices = @transform_2, window_bounds = array<i64: 8, 32>}, {transform_indices = @transform_3, window_bounds = array<i64: 8, 4>}, {transform_indices = @transform_4, window_bounds = array<i64: 4, 8>}]} {
    %c0 = arith.constant 0 : index
    %c0_0 = arith.constant 0 : index
    %0 = vector.load %arg1[%c0, %c0_0] : memref<8x16xf32, #tpu.memory_space<vmem>>, vector<8x16xf32>
    %c0_1 = arith.constant 0 : index
    %c0_2 = arith.constant 0 : index
    %1 = vector.load %arg2[%c0_1, %c0_2] : memref<16x40xf32, #tpu.memory_space<vmem>>, vector<16x40xf32>
    %cst = arith.constant dense<0.000000e+00> : vector<8x40xf32>
    %2 = tpu.matmul %0, %1, %cst {dimension_numbers = #tpu.dot_dimension_numbers<[1], [0], [0], [1], [0, 0, 1, 1], [], []>} : vector<8x16xf32>, vector<16x40xf32>, vector<8x40xf32> -> vector<8x40xf32>
    %3 = vector.extract_strided_slice %2 {offsets = [0, 0], sizes = [8, 32], strides = [1, 1]} : vector<8x40xf32> to vector<8x32xf32>
    %c0_3 = arith.constant 0 : index
    %c0_4 = arith.constant 0 : index
    %4 = vector.load %arg3[%c0_3, %c0_4] : memref<8x32xf32, #tpu.memory_space<vmem>>, vector<8x32xf32>
    tpu.vector_store %arg3[%c0_3, %c0_4], %3 {strides = array<i32>} : memref<8x32xf32, #tpu.memory_space<vmem>>, vector<8x32xf32>,
    %5 = vector.extract_strided_slice %2 {offsets = [0, 32], sizes = [8, 4], strides = [1, 1]} : vector<8x40xf32> to vector<8x4xf32>
    %c0_5 = arith.constant 0 : index
    %c0_6 = arith.constant 0 : index
    %6 = vector.load %arg4[%c0_5, %c0_6] : memref<8x4xf32, #tpu.memory_space<vmem>>, vector<8x4xf32>
    tpu.vector_store %arg4[%c0_5, %c0_6], %5 {strides = array<i32>} : memref<8x4xf32, #tpu.memory_space<vmem>>, vector<8x4xf32>,
    %7 = vector.extract_strided_slice %2 {offsets = [0, 36], sizes = [8, 4], strides = [1, 1]} : vector<8x40xf32> to vector<8x4xf32>
    %8 = tpu.transpose %7, [1, 0] : vector<8x4xf32> -> vector<4x8xf32>
    %c0_7 = arith.constant 0 : index
    %c0_8 = arith.constant 0 : index
    %9 = vector.load %arg5[%c0_7, %c0_8] : memref<4x8xf32, #tpu.memory_space<vmem>>, vector<4x8xf32>
    tpu.vector_store %arg5[%c0_7, %c0_8], %8 {strides = array<i32>} : memref<4x8xf32, #tpu.memory_space<vmem>>, vector<4x8xf32>,
    return
  }
  func.func @transform_0(%arg0: i32) -> (i32, i32) {
    %c0_i32 = arith.constant 0 : i32
    %c0_i32_0 = arith.constant 0 : i32
    return %arg0, %c0_i32 : i32, i32
  }
  func.func @transform_1(%arg0: i32) -> (i32, i32) {
    %c0_i32 = arith.constant 0 : i32
    %c0_i32_0 = arith.constant 0 : i32
    %c0_i32_1 = arith.constant 0 : i32
    return %c0_i32, %c0_i32_0 : i32, i32
  }
  func.func @transform_2(%arg0: i32) -> (i32, i32) {
    %c0_i32 = arith.constant 0 : i32
    %c0_i32_0 = arith.constant 0 : i32
    return %arg0, %c0_i32 : i32, i32
  }
  func.func @transform_3(%arg0: i32) -> (i32, i32) {
    %c0_i32 = arith.constant 0 : i32
    %c0_i32_0 = arith.constant 0 : i32
    return %arg0, %c0_i32 : i32, i32
  }
  func.func @transform_4(%arg0: i32) -> (i32, i32) {
    %c0_i32 = arith.constant 0 : i32
    %c0_i32_0 = arith.constant 0 : i32
    return %c0_i32, %arg0 : i32, i32
  }
}

</mosaic_0001>

<bundles_post_ra>
// kernel: tpu_custom_call.1
= control target key start
LH: loop header
LB: loop body
LE: loop exit
PB: predicated region body
PF: predicated region fallthrough
CT: control target
= control target key end

     0   :  { %10 = vsyncpa [#allocation3], 0  ;;  %s357_s0 = inlined_call_operand.hbm [shape: f32[8,16], index: 0, kind: input, shape index: {}]   ;;  %s358_s1 = inlined_call_operand.hbm [shape: f32[16,40], index: 1, kind: input, shape index: {}]   ;;  %s359_s2 = inlined_call_operand.hbm [shape: f32[8,32], index: 2, kind: output, shape index: {0}]   ;;  %s360_s3 = inlined_call_operand.vmem [shape: f32[8,4], index: 3, kind: output, shape index: {1}]   ;;  %s361_s4 = inlined_call_operand.hbm [shape: f32[4,8], index: 4, kind: output, shape index: {2}]  }
   0x1   :  { %11 = vsyncpa [#allocation6], 0 }
   0x2   :  { %12 = vsyncpa [#allocation4], 0 }
   0x3   :  { %13 = vsyncpa [#allocation9], 0  ;;  %s307_s15 = smov [#allocation2]   ;;  %s308_s17 = smov [#allocation5]  }
   0x4   :  { %s20_s16 = sshll.u32 %s307_s15, 4  ;;  %s29_s18 = sshll.u32 %s308_s17, 4  ;;  %s21_s16 = int_to_ptr.vmem [resolvable:$true] %s20_s16  ;;  %s30_s18 = int_to_ptr.vmem [resolvable:$true] %s29_s18 }
   0x5   :  { %s227_s19 = scalar_lea.vmem %s21_s16, 128  ;;  %p232_p1 = scmp.lt.s32.totalorder %s21_s16, %s21_s16 }
   0x6   :  { %p228_p0 = scmp.ne.s32.totalorder %s21_s16, %s227_s19  ;;  %p233_p2 = scmp.lt.s32.totalorder %s227_s19, %s227_s19 }
   0x8   :  { %p234_p3 = por %p233_p2, %p232_p1 }
   0xa   :  { %p235_p4 = pnand %p234_p3, %p228_p0 }
   0xc   :  { %238 = shalt.err (!%p235_p4)
}
   0xd   :  { %23 = dma.hbm_to_vmem [thread:$0]  %s357_s0, 128, %s21_s16, [#allocation3]  }
   0xe   :  { %s247_s22 = scalar_lea.vmem %s30_s18, 256  ;;  %p252_p6 = scmp.lt.s32.totalorder %s30_s18, %s30_s18 }
   0xf   :  { %p248_p5 = scmp.ne.s32.totalorder %s30_s18, %s247_s22  ;;  %p253_p7 = scmp.lt.s32.totalorder %s247_s22, %s247_s22 }
  0x11   :  { %p254_p8 = por %p253_p7, %p252_p6 }
  0x13   :  { %p255_p9 = pnand %p254_p8, %p248_p5 }
  0x15   :  { %258 = shalt.err (!%p255_p9)
}
  0x16   :  { %s309_s23 = smov 128   ;;  %s310_s24 = smov 8  }
  0x17   :  { %35 = dma.hbm_to_vmem [thread:$0]  %s358_s1, 256, %s30_s18, [#allocation6], %s309_s23, %s309_s23, %s310_s24  }
  0x18   :  { %299 = dma.done.wait [#allocation3], 128  }
  0x19   :  { %300 = vsyncadd [#allocation3], 4294967168 }
  0x1a   :  { %301 = dma.done.wait [#allocation6], 256  }
  0x1b   :  { %302 = vsyncadd [#allocation6], 4294967040  ;;  %v311_v0 = vmov 0.0   ;;  %vm312_vm0 = vmmov 0   ;;  %v44_v1 = vld [vmem:[#allocation5 + $0x8] sm:$0xff]  ;;  %v43_v2 = vld [vmem:[#allocation5] sm:$0xff] }
  0x1c   :  { %202 = vmatprep.subr.mxu0 %v311_v0  ;;  %206 = vmatprep.mubr.msk.f32.mxu0 %vm312_vm0, %v311_v0  ;;  %v42_v3 = vld [vmem:[#allocation2] sm:$0xff]  ;;  %vm45_vm1 = vcmask 130048   ;;  %vm119_vm2 = vcmask 261120   ;;  %s313_s0 = smov 92   ;;  %s314_s1 = smov 96  }
  0x1d   :  { %203 = vmatpush3.msra.mxu0 %v44_v1  ;;  %s315_s27 = smov [#allocation7]  }
  0x1e   :  { %204 = vmatprep.subr.mxu0 %v311_v0  ;;  %s170_s28 = sshll.u32 %s315_s27, 4  ;;  %s171_s28 = int_to_ptr.vmem [resolvable:$true] %s170_s28 }
  0x1f   :  { %205 = vmatpush3.msra.mxu0 %v43_v2  ;;  %s259_s29 = scalar_lea.vmem %s171_s28, 128  ;;  %p264_p11 = scmp.lt.s32.totalorder %s171_s28, %s171_s28 }
  0x20   :  { %207 = vmatmul.mubr.msk.f32.vlgmr.msra.gmra.mxu0 %vm45_vm1, %v42_v3  ;;  %p260_p10 = scmp.ne.s32.totalorder %s171_s28, %s259_s29  ;;  %p265_p12 = scmp.lt.s32.totalorder %s259_s29, %s259_s29 }
  0x22   :  { %p266_p13 = por %p265_p12, %p264_p11 }
  0x24   :  { %p267_p0 = pnand %p266_p13, %p260_p10 }
  0xe0   :  { %v115_v4 = vpop.f32.mrf.mxu0 }
  0xe1   :  { %127 = vrot.lane.b32.xlu0 %v115_v4, %s313_s0  ;;  %120 = vst.msk [vmem:[#allocation7] sm:$0xff] %vm119_vm2, %v115_v4 }
  0xe2   :  { %v208_v5 = vpop.f32.mrf.mxu0 }
  0xe5   :  { %122 = vrot.lane.b32.xlu0 %v115_v4, %s314_s1 }
  0xe6   :  { %270 = shalt.err (!%p267_p0)
}
  0xe7   :  { %173 = dma.vmem_to_hbm [thread:$0]  %s171_s28, 128, %s359_s2, [#allocation4]   ;;  %vm125_vm3 = vcmask 31744   ;;  %vm162_vm4 = vcmask 60416  }
  0xe8   :  { %s316_s8 = smov [#allocation8]  }
  0xe9   :  { %s182_s9 = sshll.u32 %s316_s8, 4  ;;  %s183_s9 = int_to_ptr.vmem [resolvable:$true] %s182_s9 }
  0xea   :  { %s279_s10 = scalar_lea.vmem %s183_s9, 64  ;;  %p284_p2 = scmp.lt.s32.totalorder %s183_s9, %s183_s9 }
  0xeb   :  { %p280_p1 = scmp.ne.s32.totalorder %s183_s9, %s279_s10  ;;  %p285_p3 = scmp.lt.s32.totalorder %s279_s10, %s279_s10 }
  0xed   :  { %p286_p4 = por %p285_p3, %p284_p2 }
  0xef   :  { %p287_p5 = pnand %p286_p4, %p280_p1 }
 0x153   :  { %v128_v6 = vpop.permute.xlu0 %127 }
 0x154   :  { %130 = vxpose.xlu1.b32.start.end [1/1] (short) (narrow) %v128_v6, 8 }
 0x157   :  { %v123_v7 = vpop.permute.xlu0 %122 }
 0x158   :  { %126 = vst.msk [vmem:[%s360_s3] sm:$0xff] %vm125_vm3, %v123_v7 }
 0x1d0   :  { %v146_v8 = vpop.trf.xlu1 }
 0x1d1   :  { %163 = vst.msk [vmem:[#allocation8] sm:$0xf] %vm162_vm4, %v146_v8 }
 0x1d2   :  { %290 = shalt.err (!%p287_p5)
}
 0x1d3   :  { %185 = dma.vmem_to_hbm [thread:$0]  %s183_s9, 64, %s361_s4, [#allocation9]  }
 0x1d4   :  { %303 = dma.done.wait [#allocation4], 128  }
 0x1d5   :  { %304 = vsyncadd [#allocation4], 4294967168 }
 0x1d6   :  { %305 = dma.done.wait [#allocation9], 64  }
 0x1d7   :  { %306 = vsyncadd [#allocation9], 4294967232 }
 0x1d8   :  { %194 = vsyncpa [#allocation3], 1 }
 0x1d9   :  { %195 = vsyncpa [#allocation6], 1 }
 0x1da   :  { %196 = vsyncpa [#allocation4], 1 }
 0x1db   :  { %197 = vsyncpa [#allocation9], 1 }

</bundles_post_ra>
